<compile_context>
chip_gen: v5e
topology: v5e:2x2
jax: 0.10.0
libtpu: 0.0.40
codegen_flags: <defaults>
</compile_context>

<pallas_src>
import functools
import math

import jax
import jax.numpy as jnp
from jax.experimental import pallas as pl
from jax.experimental.pallas import tpu as pltpu

IGNORE_LABEL = -1
THRESH = 0.6
MIN_KEPT = 256

LANE = 128
_SENTINEL_NLL = -1.0                   # nll written for ignore_label / pad pixels
_HARD_NLL = float(-math.log(THRESH))   # prob <= THRESH  <=>  nll >= _HARD_NLL
_NO_OHEM_THR_NLL = -0.5                # keeps all valid pixels (nll >= 0), rejects sentinel

_MAX_TILE_ROWS_K1 = 512                # kernel-1 rows (of 128 px) per tile, upper bound
_MAX_TILE_ROWS_K2 = 4096               # kernel-2 rows per tile (2 MiB / buffer)
_N_CORE_SPLIT = 2                      # leading "parallel" axis of kernel 2 (v7x 2-TC)


# --------------------------------------------------------------------------
# VMEM budgeting
# --------------------------------------------------------------------------
def _vmem_limit_bytes():
    cap = None
    try:
        info = pltpu.get_tpu_info()
        cap = getattr(info, "vmem_capacity_bytes", None)
    except Exception:
        cap = None
    if not cap:
        cap = 64 * 1024 * 1024          # v7x physical per-TC VMEM: stay safe everywhere
    return int(min(int(cap) * 3 // 4, 96 * 1024 * 1024))


def _k1_rows_cap(c, vmem_limit):
    """Rows (of 128 px) per kernel-1 tile that fit comfortably in VMEM."""
    budget = vmem_limit // 2            # leave 2x headroom for compute temps / Mosaic
    # per row: 2x double-buffered pred block (c*512 B) + tgt/nll blocks + ~3 f32
    # (c, row, 128) compute temps (logits / exp / select).
    per_row = 512 * (5 * c + 10)
    cap = budget // per_row
    return max(8, min(_MAX_TILE_ROWS_K1, (cap // 8) * 8))


# --------------------------------------------------------------------------
# Kernel 1: per-pixel NLL (sentinel for ignored) + partial hard-pixel count
# --------------------------------------------------------------------------
def _softmax_nll_kernel(pred_ref, tgt_ref, nll_ref, cnt_ref, *,
                        ignore_label, hard_nll, n_rows, tile_rows, mask_rows):
    logits = pred_ref[0].astype(jnp.float32)                 # (C, R, 128)
    tgt = tgt_ref[0]                                         # (R, 128) int32

    valid = tgt != ignore_label
    tgt_c = jnp.where(valid, tgt, 0)

    # class-axis reductions are over a non-minor axis -> pure per-vreg VALU
    m = jnp.max(logits, axis=0)                              # (R, 128)
    ex = jnp.exp(logits - m[None, :, :])                     # (C, R, 128)
    s = jnp.sum(ex, axis=0)                                  # (R, 128)

    cls = jax.lax.broadcasted_iota(jnp.int32, logits.shape, 0)
    logit_t = jnp.sum(jnp.where(cls == tgt_c[None, :, :], logits, 0.0), axis=0)

    nll = (m - logit_t) + jnp.log(s)                         # >= 0 for valid pixels
    nll = jnp.where(valid, nll, _SENTINEL_NLL)
    nll_ref[0] = nll

    # partial "hard" count (valid pixels with prob <= THRESH); sentinel (-1)
    # never passes the >= hard_nll test.  Fold rows into an (8,128) block
    # (free sublane-split reshape + vreg adds).
    kept = nll >= hard_nll
    if mask_rows:                                            # static: only if grid overhangs
        row = (jax.lax.broadcasted_iota(jnp.int32, kept.shape, 0)
               + pl.program_id(1) * tile_rows)
        kept = jnp.logical_and(kept, row < n_rows)
    kept_f = kept.astype(jnp.float32)
    cnt_ref[0, 0] = kept_f.reshape(tile_rows // 8, 8, LANE).sum(axis=0)


def _per_pixel_stats(pred4, tgt3, vmem_limit):
    b, c, n_rows, _ = pred4.shape
    tile_rows = min(_k1_rows_cap(c, vmem_limit), n_rows)
    n_tiles = -(-n_rows // tile_rows)
    kernel = functools.partial(
        _softmax_nll_kernel,
        ignore_label=IGNORE_LABEL, hard_nll=_HARD_NLL,
        n_rows=n_rows, tile_rows=tile_rows,
        mask_rows=(n_rows % tile_rows != 0))
    return pl.pallas_call(
        kernel,
        out_shape=(
            jax.ShapeDtypeStruct((b, n_rows, LANE), jnp.float32),      # nll
            jax.ShapeDtypeStruct((b, n_tiles, 8, LANE), jnp.float32),  # hard count
        ),
        grid_spec=pltpu.PrefetchScalarGridSpec(
            num_scalar_prefetch=0,
            grid=(b, n_tiles),
            in_specs=[
                pl.BlockSpec((1, c, tile_rows, LANE), lambda bi, ti: (bi, 0, ti, 0)),
                pl.BlockSpec((1, tile_rows, LANE), lambda bi, ti: (bi, ti, 0)),
            ],
            out_specs=[
                pl.BlockSpec((1, tile_rows, LANE), lambda bi, ti: (bi, ti, 0)),
                pl.BlockSpec((1, 1, 8, LANE), lambda bi, ti: (bi, ti, 0, 0)),
            ],
        ),
        compiler_params=pltpu.CompilerParams(
            dimension_semantics=("parallel", "parallel"),
            vmem_limit_bytes=vmem_limit),
    )(pred4, tgt3)


# --------------------------------------------------------------------------
# Kernel 2: OHEM-thresholded masked mean over the nll array
# --------------------------------------------------------------------------
def _ohem_reduce_kernel(thr_ref, nll_ref, psum_ref, pcnt_ref, acc_s, acc_c, *,
                        total_rows, tile_rows):
    core = pl.program_id(0)
    step = pl.program_id(1)
    steps = pl.num_programs(1)

    @pl.when(step == 0)
    def _():
        acc_s[...] = jnp.zeros_like(acc_s)
        acc_c[...] = jnp.zeros_like(acc_c)

    thr = thr_ref[0]                                         # SMEM scalar
    nll = nll_ref[...]                                       # (tile_rows, 128)

    # rows past total_rows (grid overhang / duplicated clamped block on the
    # second core) are always masked out.
    row0 = (core * steps + step) * tile_rows
    row = jax.lax.broadcasted_iota(jnp.int32, nll.shape, 0) + row0
    kept = jnp.logical_and(nll >= thr, row < total_rows)     # sentinel never kept

    # fold into fixed (8,128) accumulators: same VALU adds, no tile-sized RMW
    contrib = jnp.where(kept, nll, 0.0)
    acc_s[...] += contrib.reshape(tile_rows // 8, 8, LANE).sum(axis=0)
    acc_c[...] += kept.astype(jnp.float32).reshape(tile_rows // 8, 8, LANE).sum(axis=0)

    @pl.when(step == steps - 1)
    def _():
        psum_ref[0] = acc_s[...]
        pcnt_ref[0] = acc_c[...]


def _masked_mean(nll_rows, thr_1, vmem_limit):
    total_rows, _ = nll_rows.shape                           # multiple of 8
    tile_rows = min(_MAX_TILE_ROWS_K2, total_rows)
    n_blocks = -(-total_rows // tile_rows)
    steps_per_core = -(-n_blocks // _N_CORE_SPLIT)

    def nll_map(core, step, thr_ref):                        # prefetch ref is positional
        idx = core * steps_per_core + step
        return (jnp.minimum(idx, n_blocks - 1), 0)           # clamp; dup block masked in-kernel

    kernel = functools.partial(_ohem_reduce_kernel,
                               total_rows=total_rows, tile_rows=tile_rows)
    psum, pcnt = pl.pallas_call(
        kernel,
        out_shape=(jax.ShapeDtypeStruct((_N_CORE_SPLIT, 8, LANE), jnp.float32),
                   jax.ShapeDtypeStruct((_N_CORE_SPLIT, 8, LANE), jnp.float32)),
        grid_spec=pltpu.PrefetchScalarGridSpec(
            num_scalar_prefetch=1,                           # thr -> SMEM
            grid=(_N_CORE_SPLIT, steps_per_core),
            in_specs=[pl.BlockSpec((tile_rows, LANE), nll_map)],
            out_specs=[pl.BlockSpec((1, 8, LANE), lambda c, s, thr: (c, 0, 0)),
                       pl.BlockSpec((1, 8, LANE), lambda c, s, thr: (c, 0, 0))],
            scratch_shapes=[pltpu.VMEM((8, LANE), jnp.float32),
                            pltpu.VMEM((8, LANE), jnp.float32)],
        ),
        compiler_params=pltpu.CompilerParams(
            dimension_semantics=("parallel", "arbitrary"),
            vmem_limit_bytes=vmem_limit),
    )(thr_1, nll_rows)
    # NOTE: if no pixel is kept this is 0/0 = NaN, matching the reference.
    return jnp.sum(psum) / jnp.sum(pcnt)


# --------------------------------------------------------------------------
# base_forward equivalent
# --------------------------------------------------------------------------
def ohem_ce_loss(pred, target, vmem_limit=None):
    if vmem_limit is None:
        vmem_limit = _vmem_limit_bytes()
    b, c, h, w = pred.shape
    hw = h * w
    n = b * hw

    # lane-dense pixel layout: (B, C, n_rows, 128) with n_rows a multiple of 8.
    n_rows = 8 * (-(-hw // (8 * LANE)))
    hw_pad = n_rows * LANE

    pred_r = pred.reshape(b, c, hw)
    tgt_r = target.reshape(b, hw).astype(jnp.int32)
    if hw_pad != hw:
        # pad pixels get ignore_label -> sentinel nll in kernel 1 (never kept /
        # counted).  Only triggers when hw % 1024 != 0.
        pred_r = jnp.pad(pred_r, ((0, 0), (0, 0), (0, hw_pad - hw)))
        tgt_r = jnp.pad(tgt_r, ((0, 0), (0, hw_pad - hw)),
                        constant_values=IGNORE_LABEL)
    pred4 = pred_r.reshape(b, c, n_rows, LANE)
    tgt3 = tgt_r.reshape(b, n_rows, LANE)

    nll, hard_cnt = _per_pixel_stats(pred4, tgt3, vmem_limit)
    num_valid = jnp.sum(target != IGNORE_LABEL)
    num_hard = jnp.sum(hard_cnt)                             # valid pixels with prob <= THRESH

    # threshold selection (in nll-space): thr = min(-log(THRESH), kth-largest nll).
    # The global top_k is only run when fewer than MIN_KEPT hard pixels exist;
    # otherwise the k-th smallest prob is <= THRESH and the threshold is THRESH.
    if MIN_KEPT > 0:
        k_sel = min(MIN_KEPT, n)
        nll_flat = nll.reshape(-1)                           # sentinels are the smallest values

        def _without_topk(_):
            return jnp.float32(_HARD_NLL)

        def _with_topk(x):
            kth = jax.lax.top_k(x, k_sel)[0][k_sel - 1]
            return jnp.minimum(jnp.float32(_HARD_NLL), kth)

        thr_ohem = jax.lax.cond(num_hard >= jnp.float32(MIN_KEPT),
                                _without_topk, _with_topk, nll_flat)
    else:
        thr_ohem = jnp.float32(_HARD_NLL)

    apply_ohem = jnp.logical_and(MIN_KEPT < num_valid, num_valid > 0)
    # OHEM off -> thr = -0.5 keeps every valid pixel (nll >= 0) and rejects the
    # -1.0 sentinel written for ignore_label / pad pixels.
    thr_eff = jnp.where(apply_ohem, thr_ohem,
                        jnp.float32(_NO_OHEM_THR_NLL)).reshape(1).astype(jnp.float32)

    nll_rows = nll.reshape(b * n_rows, LANE)                 # free, lane-dense
    return _masked_mean(nll_rows, thr_eff, vmem_limit)


def ohem_forward(preds, target):
    """forward(): preds is a tuple/list of NCHW predictions; losses are summed."""
    loss = None
    for pred in preds:
        l = ohem_ce_loss(pred, target)
        loss = l if loss is None else loss + l
    return dict(loss=loss)


# --------------------------------------------------------------------------
# Pure-JAX reference (for correctness check)
# --------------------------------------------------------------------------
def _reference_single(pred, target):
    b, c, h, w = pred.shape
    tgt = target.reshape(-1)
    valid = tgt != IGNORE_LABEL
    tgt_c = jnp.where(valid, tgt, 0)
    num_valid = jnp.sum(valid)
    logits = jnp.transpose(pred, (1, 0, 2, 3)).reshape(c, -1)
    logp = jax.nn.log_softmax(logits, axis=0)
    idx = jnp.arange(tgt.shape[0])
    nll = -logp[tgt_c, idx]
    prob = jnp.exp(logp[tgt_c, idx])
    mask_prob = jnp.where(valid, prob, 1.0)
    k = min(MIN_KEPT, tgt.shape[0]) - 1
    kth = jnp.sort(mask_prob)[k]
    threshold = jnp.maximum(jnp.float32(THRESH), kth)
    apply_ohem = jnp.logical_and(MIN_KEPT < num_valid, num_valid > 0)
    thr = jnp.where(apply_ohem, threshold, jnp.float32(jnp.inf))
    kept = jnp.logical_and(mask_prob <= thr, valid)
    keptf = kept.astype(jnp.float32)
    return jnp.sum(nll * keptf) / jnp.sum(keptf)


def _reference(preds, target):
    return sum(_reference_single(p, target) for p in preds)


# --------------------------------------------------------------------------
if __name__ == "__main__":
    key = jax.random.PRNGKey(0)
    k1, k2, k3, k4 = jax.random.split(key, 4)

    B, C, H, W = 2, 4, 16, 16
    pred0 = jax.random.normal(k1, (B, C, H, W), dtype=jnp.float32)
    pred1 = jax.random.normal(k2, (B, C, H, W), dtype=jnp.float32)
    # targets in [-1, C): includes ignore_label = -1 pixels
    target = jax.random.randint(k3, (B, H, W), minval=-1, maxval=C,
                                dtype=jnp.int32)
    # a confident prediction so the guarded top_k branch (few hard pixels) is
    # exercised as well as the skip branch.
    tgt_c = jnp.where(target >= 0, target, 0)
    onehot = jnp.transpose(jax.nn.one_hot(tgt_c, C, dtype=jnp.float32),
                           (0, 3, 1, 2))
    pred2 = 6.0 * onehot + 0.3 * jax.random.normal(k4, (B, C, H, W),
                                                   dtype=jnp.float32)

    fwd = jax.jit(ohem_forward)
    out = fwd((pred0, pred1, pred2), target)
    loss = jax.block_until_ready(out["loss"])

    ref = jax.block_until_ready(_reference((pred0, pred1, pred2), target))
    assert jnp.allclose(loss, ref, rtol=1e-4, atol=1e-4), (loss, ref)

    print("KERNEL_OK")
</pallas_src>

<mosaic_0001>
module attributes {stable_mosaic.version = 11 : i64} {
  func.func @_softmax_nll_kernel(%arg0: i32, %arg1: i32, %arg2: memref<1x4x8x128xf32, #tpu.memory_space<vmem>>, %arg3: memref<1x8x128xi32, #tpu.memory_space<vmem>>, %arg4: memref<1x8x128xf32, #tpu.memory_space<vmem>>, %arg5: memref<1x1x8x128xf32, #tpu.memory_space<vmem>>) attributes {dimension_semantics = [#tpu.dimension_semantics<parallel>, #tpu.dimension_semantics<parallel>], iteration_bounds = array<i64: 2, 1>, scalar_prefetch = 0 : i64, scratch_operands = 0 : i64, tpu.core_type = #tpu.core_type<tc>, window_params = [{transform_indices = @transform_0, window_bounds = array<i64: 1, 4, 8, 128>}, {transform_indices = @transform_1, window_bounds = array<i64: 1, 8, 128>}, {transform_indices = @transform_2, window_bounds = array<i64: 1, 8, 128>}, {transform_indices = @transform_3, window_bounds = array<i64: 1, 1, 8, 128>}]} {
    %c0 = arith.constant 0 : index
    %c0_0 = arith.constant 0 : index
    %c0_1 = arith.constant 0 : index
    %c0_2 = arith.constant 0 : index
    %0 = vector.load %arg2[%c0, %c0_0, %c0_1, %c0_2] : memref<1x4x8x128xf32, #tpu.memory_space<vmem>>, vector<1x4x8x128xf32>
    %1 = vector.shape_cast %0 : vector<1x4x8x128xf32> to vector<4x8x128xf32>
    %c0_3 = arith.constant 0 : index
    %c0_4 = arith.constant 0 : index
    %c0_5 = arith.constant 0 : index
    %2 = vector.load %arg3[%c0_3, %c0_4, %c0_5] : memref<1x8x128xi32, #tpu.memory_space<vmem>>, vector<1x8x128xi32>
    %3 = vector.shape_cast %2 : vector<1x8x128xi32> to vector<8x128xi32>
    %c-1_i32 = arith.constant -1 : i32
    %4 = vector.broadcast %c-1_i32 : i32 to vector<8x128xi32>
    %5 = arith.cmpi ne, %3, %4 : vector<8x128xi32>
    %c0_i32 = arith.constant 0 : i32
    %6 = vector.broadcast %c0_i32 : i32 to vector<8x128xi32>
    %7 = arith.select %5, %3, %6 : vector<8x128xi1>, vector<8x128xi32>
    %cst = arith.constant dense<0xFF800000> : vector<8x128xf32>
    %8 = vector.multi_reduction <maximumf>, %1, %cst [0] : vector<4x8x128xf32> to vector<8x128xf32>
    %9 = vector.shape_cast %8 : vector<8x128xf32> to vector<1x8x128xf32>
    %10 = vector.broadcast %9 : vector<1x8x128xf32> to vector<4x8x128xf32>
    %11 = arith.subf %1, %10 : vector<4x8x128xf32>
    %12 = math.exp %11 : vector<4x8x128xf32>
    %cst_6 = arith.constant dense<0.000000e+00> : vector<8x128xf32>
    %13 = vector.multi_reduction <add>, %12, %cst_6 [0] : vector<4x8x128xf32> to vector<8x128xf32>
    %14 = tpu.iota {dimensions = array<i32: 0>} : vector<4x8x128xi32>
    %15 = vector.shape_cast %7 : vector<8x128xi32> to vector<1x8x128xi32>
    %16 = vector.broadcast %15 : vector<1x8x128xi32> to vector<4x8x128xi32>
    %17 = arith.cmpi eq, %14, %16 : vector<4x8x128xi32>
    %cst_7 = arith.constant 0.000000e+00 : f32
    %18 = vector.broadcast %cst_7 : f32 to vector<4x8x128xf32>
    %19 = arith.select %17, %1, %18 : vector<4x8x128xi1>, vector<4x8x128xf32>
    %cst_8 = arith.constant dense<0.000000e+00> : vector<8x128xf32>
    %20 = vector.multi_reduction <add>, %19, %cst_8 [0] : vector<4x8x128xf32> to vector<8x128xf32>
    %21 = arith.subf %8, %20 : vector<8x128xf32>
    %22 = math.log %13 : vector<8x128xf32>
    %23 = arith.addf %21, %22 : vector<8x128xf32>
    %cst_9 = arith.constant -1.000000e+00 : f32
    %24 = vector.broadcast %cst_9 : f32 to vector<8x128xf32>
    %25 = arith.select %5, %23, %24 : vector<8x128xi1>, vector<8x128xf32>
    %c0_10 = arith.constant 0 : index
    %c0_11 = arith.constant 0 : index
    %c0_12 = arith.constant 0 : index
    %26 = vector.load %arg4[%c0_10, %c0_11, %c0_12] : memref<1x8x128xf32, #tpu.memory_space<vmem>>, vector<1x8x128xf32>
    %27 = vector.shape_cast %26 : vector<1x8x128xf32> to vector<8x128xf32>
    %28 = vector.shape_cast %25 : vector<8x128xf32> to vector<1x8x128xf32>
    tpu.vector_store %arg4[%c0_10, %c0_11, %c0_12], %28 {strides = array<i32>} : memref<1x8x128xf32, #tpu.memory_space<vmem>>, vector<1x8x128xf32>,
    %cst_13 = arith.constant 0.510825634 : f32
    %29 = vector.broadcast %cst_13 : f32 to vector<8x128xf32>
    %30 = arith.cmpf oge, %25, %29 : vector<8x128xf32>
    %31 = arith.extui %30 : vector<8x128xi1> to vector<8x128xi32>
    %32 = arith.sitofp %31 : vector<8x128xi32> to vector<8x128xf32>
    %33 = vector.shape_cast %32 : vector<8x128xf32> to vector<1x8x128xf32>
    %cst_14 = arith.constant dense<0.000000e+00> : vector<8x128xf32>
    %34 = vector.multi_reduction <add>, %33, %cst_14 [0] : vector<1x8x128xf32> to vector<8x128xf32>
    %c0_15 = arith.constant 0 : index
    %c0_16 = arith.constant 0 : index
    %c0_17 = arith.constant 0 : index
    %c0_18 = arith.constant 0 : index
    %35 = vector.load %arg5[%c0_15, %c0_16, %c0_17, %c0_18] : memref<1x1x8x128xf32, #tpu.memory_space<vmem>>, vector<1x1x8x128xf32>
    %36 = vector.shape_cast %35 : vector<1x1x8x128xf32> to vector<8x128xf32>
    %37 = vector.shape_cast %34 : vector<8x128xf32> to vector<1x1x8x128xf32>
    tpu.vector_store %arg5[%c0_15, %c0_16, %c0_17, %c0_18], %37 {strides = array<i32>} : memref<1x1x8x128xf32, #tpu.memory_space<vmem>>, vector<1x1x8x128xf32>,
    return
  }
  func.func @transform_0(%arg0: i32, %arg1: i32) -> (i32, i32, i32, i32) {
    %c0_i32 = arith.constant 0 : i32
    %c0_i32_0 = arith.constant 0 : i32
    %c0_i32_1 = arith.constant 0 : i32
    return %arg0, %c0_i32, %arg1, %c0_i32_0 : i32, i32, i32, i32
  }
  func.func @transform_1(%arg0: i32, %arg1: i32) -> (i32, i32, i32) {
    %c0_i32 = arith.constant 0 : i32
    %c0_i32_0 = arith.constant 0 : i32
    return %arg0, %arg1, %c0_i32 : i32, i32, i32
  }
  func.func @transform_2(%arg0: i32, %arg1: i32) -> (i32, i32, i32) {
    %c0_i32 = arith.constant 0 : i32
    %c0_i32_0 = arith.constant 0 : i32
    return %arg0, %arg1, %c0_i32 : i32, i32, i32
  }
  func.func @transform_3(%arg0: i32, %arg1: i32) -> (i32, i32, i32, i32) {
    %c0_i32 = arith.constant 0 : i32
    %c0_i32_0 = arith.constant 0 : i32
    %c0_i32_1 = arith.constant 0 : i32
    return %arg0, %arg1, %c0_i32, %c0_i32_0 : i32, i32, i32, i32
  }
}

module attributes {stable_mosaic.version = 11 : i64} {
  func.func @_ohem_reduce_kernel(%arg0: i32, %arg1: i32, %arg2: memref<1xf32, #tpu.memory_space<smem>>, %arg3: memref<16x128xf32, #tpu.memory_space<vmem>>, %arg4: memref<1x8x128xf32, #tpu.memory_space<vmem>>, %arg5: memref<1x8x128xf32, #tpu.memory_space<vmem>>, %arg6: memref<8x128xf32, #tpu.memory_space<vmem>>, %arg7: memref<8x128xf32, #tpu.memory_space<vmem>>) attributes {dimension_semantics = [#tpu.dimension_semantics<parallel>, #tpu.dimension_semantics<arbitrary>], iteration_bounds = array<i64: 2, 1>, scalar_prefetch = 1 : i64, scratch_operands = 2 : i64, tpu.core_type = #tpu.core_type<tc>, window_params = [{transform_indices = @transform_0, window_bounds = array<i64: 16, 128>}, {transform_indices = @transform_1, window_bounds = array<i64: 1, 8, 128>}, {transform_indices = @transform_2, window_bounds = array<i64: 1, 8, 128>}]} {
    %c0_i32 = arith.constant 0 : i32
    %0 = arith.cmpi eq, %arg1, %c0_i32 : i32
    %1 = arith.extui %0 : i1 to i32
    %c0_i32_0 = arith.constant 0 : i32
    %2 = arith.cmpi ne, %1, %c0_i32_0 : i32
    scf.if %2 {
      %cst_16 = arith.constant 0.000000e+00 : f32
      %33 = vector.broadcast %cst_16 : f32 to vector<8x128xf32>
      %c0_17 = arith.constant 0 : index
      %c0_18 = arith.constant 0 : index
      %34 = vector.load %arg6[%c0_17, %c0_18] : memref<8x128xf32, #tpu.memory_space<vmem>>, vector<8x128xf32>
      tpu.vector_store %arg6[%c0_17, %c0_18], %33 {strides = array<i32>} : memref<8x128xf32, #tpu.memory_space<vmem>>, vector<8x128xf32>,
      %cst_19 = arith.constant 0.000000e+00 : f32
      %35 = vector.broadcast %cst_19 : f32 to vector<8x128xf32>
      %c0_20 = arith.constant 0 : index
      %c0_21 = arith.constant 0 : index
      %36 = vector.load %arg7[%c0_20, %c0_21] : memref<8x128xf32, #tpu.memory_space<vmem>>, vector<8x128xf32>
      tpu.vector_store %arg7[%c0_20, %c0_21], %35 {strides = array<i32>} : memref<8x128xf32, #tpu.memory_space<vmem>>, vector<8x128xf32>,
    } else {
    }
    %c0 = arith.constant 0 : index
    %3 = memref.load %arg2[%c0] : memref<1xf32, #tpu.memory_space<smem>>
    %c0_1 = arith.constant 0 : index
    %c0_2 = arith.constant 0 : index
    %4 = vector.load %arg3[%c0_1, %c0_2] : memref<16x128xf32, #tpu.memory_space<vmem>>, vector<16x128xf32>
    %c1_i32 = arith.constant 1 : i32
    %5 = arith.muli %arg0, %c1_i32 : i32
    %6 = arith.addi %5, %arg1 : i32
    %c16_i32 = arith.constant 16 : i32
    %7 = arith.muli %6, %c16_i32 : i32
    %8 = tpu.iota {dimensions = array<i32: 0>} : vector<16x128xi32>
    %9 = vector.broadcast %7 : i32 to vector<16x128xi32>
    %10 = arith.addi %8, %9 : vector<16x128xi32>
    %11 = vector.broadcast %3 : f32 to vector<16x128xf32>
    %12 = arith.cmpf oge, %4, %11 : vector<16x128xf32>
    %c16_i32_3 = arith.constant 16 : i32
    %13 = vector.broadcast %c16_i32_3 : i32 to vector<16x128xi32>
    %14 = arith.cmpi slt, %10, %13 : vector<16x128xi32>
    %15 = arith.andi %12, %14 : vector<16x128xi1>
    %cst = arith.constant 0.000000e+00 : f32
    %16 = vector.broadcast %cst : f32 to vector<16x128xf32>
    %17 = arith.select %15, %4, %16 : vector<16x128xi1>, vector<16x128xf32>
    %c0_4 = arith.constant 0 : index
    %c0_5 = arith.constant 0 : index
    %18 = vector.load %arg6[%c0_4, %c0_5] : memref<8x128xf32, #tpu.memory_space<vmem>>, vector<8x128xf32>
    %19 = vector.shape_cast %17 : vector<16x128xf32> to vector<2x8x128xf32>
    %cst_6 = arith.constant dense<0.000000e+00> : vector<8x128xf32>
    %20 = vector.multi_reduction <add>, %19, %cst_6 [0] : vector<2x8x128xf32> to vector<8x128xf32>
    %21 = arith.addf %18, %20 : vector<8x128xf32>
    %c0_7 = arith.constant 0 : index
    %c0_8 = arith.constant 0 : index
    %22 = vector.load %arg6[%c0_7, %c0_8] : memref<8x128xf32, #tpu.memory_space<vmem>>, vector<8x128xf32>
    tpu.vector_store %arg6[%c0_7, %c0_8], %21 {strides = array<i32>} : memref<8x128xf32, #tpu.memory_space<vmem>>, vector<8x128xf32>,
    %c0_9 = arith.constant 0 : index
    %c0_10 = arith.constant 0 : index
    %23 = vector.load %arg7[%c0_9, %c0_10] : memref<8x128xf32, #tpu.memory_space<vmem>>, vector<8x128xf32>
    %24 = arith.extui %15 : vector<16x128xi1> to vector<16x128xi32>
    %25 = arith.sitofp %24 : vector<16x128xi32> to vector<16x128xf32>
    %26 = vector.shape_cast %25 : vector<16x128xf32> to vector<2x8x128xf32>
    %cst_11 = arith.constant dense<0.000000e+00> : vector<8x128xf32>
    %27 = vector.multi_reduction <add>, %26, %cst_11 [0] : vector<2x8x128xf32> to vector<8x128xf32>
    %28 = arith.addf %23, %27 : vector<8x128xf32>
    %c0_12 = arith.constant 0 : index
    %c0_13 = arith.constant 0 : index
    %29 = vector.load %arg7[%c0_12, %c0_13] : memref<8x128xf32, #tpu.memory_space<vmem>>, vector<8x128xf32>
    tpu.vector_store %arg7[%c0_12, %c0_13], %28 {strides = array<i32>} : memref<8x128xf32, #tpu.memory_space<vmem>>, vector<8x128xf32>,
    %c0_i32_14 = arith.constant 0 : i32
    %30 = arith.cmpi eq, %arg1, %c0_i32_14 : i32
    %31 = arith.extui %30 : i1 to i32
    %c0_i32_15 = arith.constant 0 : i32
    %32 = arith.cmpi ne, %31, %c0_i32_15 : i32
    scf.if %32 {
      %c0_16 = arith.constant 0 : index
      %c0_17 = arith.constant 0 : index
      %33 = vector.load %arg6[%c0_16, %c0_17] : memref<8x128xf32, #tpu.memory_space<vmem>>, vector<8x128xf32>
      %c0_18 = arith.constant 0 : index
      %c0_19 = arith.constant 0 : index
      %c0_20 = arith.constant 0 : index
      %34 = vector.load %arg4[%c0_18, %c0_19, %c0_20] : memref<1x8x128xf32, #tpu.memory_space<vmem>>, vector<1x8x128xf32>
      %35 = vector.shape_cast %34 : vector<1x8x128xf32> to vector<8x128xf32>
      %36 = vector.shape_cast %33 : vector<8x128xf32> to vector<1x8x128xf32>
      tpu.vector_store %arg4[%c0_18, %c0_19, %c0_20], %36 {strides = array<i32>} : memref<1x8x128xf32, #tpu.memory_space<vmem>>, vector<1x8x128xf32>,
      %c0_21 = arith.constant 0 : index
      %c0_22 = arith.constant 0 : index
      %37 = vector.load %arg7[%c0_21, %c0_22] : memref<8x128xf32, #tpu.memory_space<vmem>>, vector<8x128xf32>
      %c0_23 = arith.constant 0 : index
      %c0_24 = arith.constant 0 : index
      %c0_25 = arith.constant 0 : index
      %38 = vector.load %arg5[%c0_23, %c0_24, %c0_25] : memref<1x8x128xf32, #tpu.memory_space<vmem>>, vector<1x8x128xf32>
      %39 = vector.shape_cast %38 : vector<1x8x128xf32> to vector<8x128xf32>
      %40 = vector.shape_cast %37 : vector<8x128xf32> to vector<1x8x128xf32>
      tpu.vector_store %arg5[%c0_23, %c0_24, %c0_25], %40 {strides = array<i32>} : memref<1x8x128xf32, #tpu.memory_space<vmem>>, vector<1x8x128xf32>,
    } else {
    }
    return
  }
  func.func @transform_0(%arg0: i32, %arg1: i32, %arg2: memref<1xf32, #tpu.memory_space<smem>>) -> (i32, i32) {
    %c1_i32 = arith.constant 1 : i32
    %0 = arith.muli %arg0, %c1_i32 : i32
    %1 = arith.addi %0, %arg1 : i32
    %c0_i32 = arith.constant 0 : i32
    %2 = arith.minsi %1, %c0_i32 : i32
    %c0_i32_0 = arith.constant 0 : i32
    %c0_i32_1 = arith.constant 0 : i32
    return %2, %c0_i32_0 : i32, i32
  }
  func.func @transform_1(%arg0: i32, %arg1: i32, %arg2: memref<1xf32, #tpu.memory_space<smem>>) -> (i32, i32, i32) {
    %c0_i32 = arith.constant 0 : i32
    %c0_i32_0 = arith.constant 0 : i32
    %c0_i32_1 = arith.constant 0 : i32
    return %arg0, %c0_i32, %c0_i32_0 : i32, i32, i32
  }
  func.func @transform_2(%arg0: i32, %arg1: i32, %arg2: memref<1xf32, #tpu.memory_space<smem>>) -> (i32, i32, i32) {
    %c0_i32 = arith.constant 0 : i32
    %c0_i32_0 = arith.constant 0 : i32
    %c0_i32_1 = arith.constant 0 : i32
    return %arg0, %c0_i32, %c0_i32_0 : i32, i32, i32
  }
}

</mosaic_0001>

<bundles_post_ra>
// kernel: ohem_forward.8
= control target key start
LH: loop header
LB: loop body
LE: loop exit
PB: predicated region body
PF: predicated region fallthrough
CT: control target
= control target key end

     0   :  { %9 = vsyncpa [#allocation3], 0  ;;  %s731_s0 = inlined_call_operand.vmem [shape: f32[2,4,8,128], index: 0, kind: input, shape index: {}]   ;;  %s732_s1 = inlined_call_operand.vmem [shape: s32[2,8,128], index: 1, kind: input, shape index: {}]   ;;  %s733_s2 = inlined_call_operand.hbm [shape: f32[2,8,128], index: 2, kind: output, shape index: {0}]   ;;  %s734_s3 = inlined_call_operand.vmem [shape: f32[2,1,8,128], index: 3, kind: output, shape index: {1}]  }
   0x1   :  { %11 = vsyncpa [#allocation3 + $0x1], 0  ;;  %s618_s12 = smov 0   ;;  %s620_s13 = smov 0  }
   0x2   :  { %s622_s14 = smov 0   ;;  %s624_s15 = smov 0  }
   0x3   :  { %s626_s16 = smov 0   ;;  %s628_s17 = smov 0  }
   0x4 LB: > { %s435_s18 = sadd.s32 4294967295, %s595_s17   ;;  %s436_s19 = sadd.s32 4294967294, %s595_s17   ;;  %s595_s17 = sphi %s628_s17, %s17_s17   ;;  %s591_s16 = sphi %s626_s16, %s741_s16   ;;  %s587_s15 = sphi %s624_s15, %s740_s15   ;;  %s583_s14 = sphi %s622_s14, %s739_s14   ;;  %s579_s13 = sphi %s620_s13, %s738_s13   ;;  %s575_s12 = sphi %s618_s12, %s737_s12  }
   0x5   : > { %s29_s20 = sadd.s32 1, %s591_s16  ;;  %s94_s21 = sadd.s32 1, %s583_s14 }
   0x6   : > { %p31_p0 = scmp.ge.s32.totalorder %s29_s20, 2  ;;  %p104_p1 = scmp.ne.s32.totalorder %s583_s14, %s579_s13 }
   0x7   : > { %p105_p2 = scmp.eq.s32.totalorder %s435_s18, 1  ;;  %p110_p3 = scmp.ne.s32.totalorder %s579_s13, %s575_s12 }
   0x8   : > { %s743_s20 = smov (%p31_p0, %s29_s20), 0  ;;  %p111_p5 = scmp.eq.s32.totalorder %s436_s19, 1 }
   0x9   : > { %p658_p4 = por %p105_p2, %p104_p1  ;;  %s89_s23 = ssub.s32 %s591_s16, %s743_s20 }
   0xa   : > { %p439_p6 = scmp.ge.s32.totalorder %s595_s17, 1  ;;  %p92_p7 = scmp.eq.s32.totalorder %s89_s23, 0 }
   0xb   : > { %p665_p8 = por %p111_p5, %p110_p3  ;;  %p178_p9 = scmp.lt.s32.totalorder %s595_s17, 3 }
   0xc   : > { %s671_s25 = scalar_select %p92_p7, %s583_s14, %s94_s21  }
   0xd   : > { %p179_p10 = pnand %p439_p6, %p178_p9 }
   0xe   : > { %p219_p11 = scmp.lt.s32.totalorder (!%p179_p10), %s587_s15, 1  ;;  %s207_s8 = sand.u32 (!%p179_p10), 1, %s579_s13  }
   0xf   : > { %182 = sbr.rel (%p179_p10) target bundleno = 64 (0x40), region = 28  ;;  %s440_s9 = sshll.u32 (!%p179_p10), %s207_s8, 3 }
  0x10   : > { %s447_s10 = sshll.u32 (!%p179_p10), %s587_s15, 3  ;;  %s209_s21 = scalar_lea.vmem (!%p179_p10), [#allocation2], %s440_s9 }
  0x11   : > { %s307_s19 = scalar_lea.hbm (!%p179_p10), %s733_s2, %s447_s10  ;;  %s309_s23 = sshll.u32 (!%p179_p10), %s209_s21, 4  ;;  %s310_s23 = int_to_ptr.vmem [resolvable:$true] %s309_s23 }
  0x14   : > { %s675_s26 = scalar_select %p219_p11, %s587_s15, 1  ;;  %v597_v36 = vmov 0.0  }
  0x16   : > { %s450_s27 = sshll.u32 %s675_s26, 5  ;;  %s443_s28 = sshll.u32 %s675_s26, 3 }
  0x17   : > { %s226_s4 = scalar_lea.vmem %s731_s0, %s450_s27  ;;  %s233_s7 = scalar_lea.vmem %s732_s1, %s443_s28 }
  0x18   : > { %v241_v0 = vld [vmem:[%s226_s4] sm:$0xff]  ;;  %v242_v1 = vld [vmem:[%s226_s4 + $0x8] sm:$0xff]  ;;  %v243_v2 = vld [vmem:[%s226_s4 + $0x10] sm:$0xff]  ;;  %s311_s27 = sshll.u32 %s307_s19, 4  ;;  %s240_s15 = scalar_lea.vmem %s734_s3, %s443_s28  ;;  %s312_s27 = int_to_ptr.hbm [resolvable:$true] %s311_s27 }
  0x19   : > { %v244_v3 = vld [vmem:[%s226_s4 + $0x18] sm:$0xff]  ;;  %v245_v4 = vld [vmem:[%s233_s7] sm:$0xff]  ;;  %v248_v5 = vmax.f32 %v241_v0, %v242_v1  ;;  %s289_s4 = scalar_lea.sflag [#allocation3], %s207_s8  ;;  %s531_s5 = sshra.s32 %s312_s27, 4  ;;  %s532_s5 = int_to_ptr.hbm [resolvable:$true] %s531_s5 }
  0x1a   : > { %v249_v6 = vmax.f32 %v243_v2, %v244_v3  ;;  %vm246_vm0 = vcmp.ne.s32.totalorder %v245_v4, 4294967295  ;;  %s533_s6 = scalar_lea.hbm %s532_s5, 8  ;;  %s537_s26 = scalar_lea.hbm %s733_s2, 16 }
  0x1b   : > { %v247_v12 = vsel %vm246_vm0, %v245_v4, 0  ;;  %p534_p12 = scmp.ne.s32.totalorder %s532_s5, %s533_s6  ;;  %p538_p1 = scmp.lt.s32.totalorder %s532_s5, %s733_s2 }
  0x1c   : > { %v250_v7 = vmax.f32 %v248_v5, %v249_v6  ;;  %vm266_vm1 = vcmp.eq.s32.totalorder %v247_v12, 0  ;;  %vm267_vm2 = vcmp.eq.s32.totalorder %v247_v12, 1  ;;  %vm268_vm3 = vcmp.eq.s32.totalorder %v247_v12, 2  ;;  %p539_p2 = scmp.lt.s32.totalorder %s537_s26, %s533_s6 }
  0x1d   : > { %v270_v17 = vsel %vm266_vm1, %v241_v0, 0.0  ;;  %v271_v18 = vsel %vm267_vm2, %v242_v1, 0.0  ;;  %v272_v24 = vsel %vm268_vm3, %v243_v2, 0.0  ;;  %vm269_vm4 = vcmp.eq.s32.totalorder %v247_v12, 3  ;;  %p535_p13 = pnand %p534_p12, %p658_p4 }
  0x1e   : > { %v251_v8 = vsub.f32 %v241_v0, %v250_v7  ;;  %v252_v9 = vsub.f32 %v242_v1, %v250_v7  ;;  %v253_v10 = vsub.f32 %v243_v2, %v250_v7  ;;  %v254_v11 = vsub.f32 %v244_v3, %v250_v7  ;;  %p540_p3 = por %p539_p2, %p538_p1 }
  0x1f   : > { %v274_v21 = vadd.f32 %v271_v18, %v270_v17  ;;  %v273_v29 = vsel %vm269_vm4, %v244_v3, 0.0  ;;  %p536_p0 = pneg %p535_p13 }
  0x20   : > { %v255_v13 = vmul.f32 1.442695, %v251_v8  ;;  %v257_v14 = vmul.f32 1.442695, %v252_v9  ;;  %v259_v15 = vmul.f32 1.442695, %v253_v10 }
  0x21   : > { %v261_v16 = vmul.f32 1.442695, %v254_v11  ;;  %v275_v27 = vadd.f32 %v274_v21, %v272_v24  ;;  %p541_p5 = pnand %p540_p3, %p536_p0 }
  0x22   : > { %507 = vpow2.f32 %v255_v13 }
  0x23   : > { %509 = vpow2.f32 %v257_v14  ;;  %v276_v30 = vadd.f32 %v275_v27, %v273_v29 }
  0x24   : > { %511 = vpow2.f32 %v259_v15 }
  0x25   : > { %513 = vpow2.f32 %v261_v16  ;;  %v277_v31 = vsub.f32 %v250_v7, %v276_v30 }
  0x28   : > { %v508_v19 = vpop.eup %507 }
  0x29   : > { %v510_v20 = vpop.eup %509 }
  0x2a   : > { %v512_v22 = vpop.eup %511  ;;  %v263_v23 = vadd.f32 %v510_v20, %v508_v19 }
  0x2b   : > { %v514_v25 = vpop.eup %513 }
  0x2c   : > { %v264_v26 = vadd.f32 %v512_v22, %v263_v23 }
  0x2e   : > { %v265_v28 = vadd.f32 %v514_v25, %v264_v26 }
  0x30   : > { %515 = vlog2.f32 %v265_v28 }
  0x36   : > { %v516_v32 = vpop.eup %515 }
  0x37   : > { %v279_v33 = vmul.f32 0.6931472, %v516_v32 }
  0x39   : > { %v280_v34 = vadd.f32 %v279_v33, %v277_v31 }
  0x3b   : > { %v281_v35 = vsel %vm246_vm0, %v280_v34, -1.0 }
  0x3c   : > { %282 = vst [vmem:[%s209_s21] sm:$0xff] %v281_v35  ;;  %vm283_vm5 = vcmp.ge.f32.partialorder %v281_v35, 0.51082563 }
  0x3d   : > { %v445_v37 = vsel %vm283_vm5, 1.0, %v597_v36 }
  0x3e   : > { %544 = shalt.err (!%p541_p5)
}
  0x3f   : > { %451 = dma.vmem_to_hbm [thread:$0]  (%p658_p4), %s310_s23, 128, %s312_s27, %s289_s4   ;;  %287 = vst [vmem:[%s240_s15] sm:$0xff] %v445_v37 }
  0x40 PF: > { %p457_p6 = scmp.ge.s32.totalorder %s595_s17, 2  ;;  %s326_s28 = sand.u32 1, %s575_s12  }
  0x41   : > { %s327_s8 = scalar_lea.sflag [#allocation3], %s326_s28 }
  0x42   : > { %p454_p7 = pnand %p457_p6, %p665_p8 }
  0x44   : > { %p455_p9 = pneg %p454_p7 }
  0x46   : > { %570 = dma.done.wait (%p455_p9), %s327_s8, 128  }
  0x47   : > { %572 = vsyncadd (%p455_p9), %s327_s8, 4294967168  ;;  %s17_s17 = sadd.s32 1, %s595_s17   ;;  %s737_s12 = smov %s579_s13 }
  0x48   : > { %p14_p10 = scmp.ge.s32.totalorder %s17_s17, 4   ;;  %s738_s13 = smov %s583_s14 }
  0x49   : > { %s739_s14 = smov %s671_s25  ;;  %s740_s15 = smov %s591_s16 }
  0x4a   : > { %s741_s16 = smov %s743_s20  ;;  %16 = sbr.rel (!%p14_p10) target bundleno = 4 (0x4), region = 78 }
  0x4f   :  { %343 = vsyncpa [#allocation3], 1 }
  0x50   :  { %345 = vsyncpa [#allocation3 + $0x1], 1 }

// kernel: ohem_forward.9
= control target key start
LH: loop header
LB: loop body
LE: loop exit
PB: predicated region body
PF: predicated region fallthrough
CT: control target
= control target key end

     0   :  { %s615_s0 = inlined_call_operand.<no memory space> [shape: f32[1], index: 0, kind: input, shape index: {}]   ;;  %s616_s1 = inlined_call_operand.hbm [shape: f32[16,128], index: 1, kind: input, shape index: {}]   ;;  %s617_s2 = inlined_call_operand.vmem [shape: f32[2,8,128], index: 2, kind: output, shape index: {0}]   ;;  %s618_s3 = inlined_call_operand.vmem [shape: f32[2,8,128], index: 3, kind: output, shape index: {1}]  }
   0x1   :  { %9 = sst [smem:[#allocation5]] %s615_s0 }
   0x2   :  { %10 = vsyncpa [#allocation7], 0 }
   0x3   :  { %12 = vsyncpa [#allocation7 + $0x1], 0  ;;  %s532_s14 = smov 0   ;;  %s534_s15 = smov 0  }
   0x4   :  { %s536_s16 = smov 0   ;;  %s538_s17 = smov 0  }
   0x5   :  { %s540_s18 = smov 0  }
   0x6 LB: > { %s351_s0 = sadd.s32 4294967295, %s503_s18   ;;  %s30_s19 = sadd.s32 1, %s499_s17  ;;  %s503_s18 = sphi %s540_s18, %s18_s18   ;;  %s499_s17 = sphi %s538_s17, %s623_s17   ;;  %s495_s16 = sphi %s536_s16, %s622_s16   ;;  %s491_s15 = sphi %s534_s15, %s605_s15   ;;  %s487_s14 = sphi %s532_s14, %s621_s14  }
   0x7   : > { %p32_p0 = scmp.ge.s32.totalorder %s30_s19, 2  ;;  %p484_p1 = scmp.ne.s32.totalorder %s491_s15, 0 }
   0x8   : > { %p51_p2 = scmp.eq.s32.totalorder %s503_s18, 0  ;;  %p56_p3 = scmp.ne.s32.totalorder %s491_s15, %s487_s14 }
   0x9   : > { %s625_s19 = smov (%p32_p0, %s30_s19), 0  ;;  %p57_p4 = scmp.eq.s32.totalorder %s351_s0, 0 }
   0xa   : > { %p52_p5 = por %p484_p1, %p51_p2  ;;  %p374_p7 = scmp.lt.s32.totalorder %s503_s18, 2 }
   0xb   : > { %p562_p6 = por %p57_p4, %p56_p3  ;;  %s145_s23 = sshll.u32 %s616_s1, 4  ;;  %s146_s23 = int_to_ptr.hbm [resolvable:$true] %s145_s23 }
   0xc   : > { %s505_s24 = smov [#allocation6]   ;;  %p570_p8 = pnand %p374_p7, %p52_p5 }
   0xd   : > { %s147_s25 = sshll.u32 %s505_s24, 4  ;;  %p358_p9 = scmp.ge.s32.totalorder %s503_s18, 1  ;;  %s148_s25 = int_to_ptr.vmem [resolvable:$true] %s147_s25 }
   0xe   : > { %p155_p10 = scmp.lt.s32.totalorder %s503_s18, 3  ;;  %s426_s27 = sshra.s32 %s146_s23, 4  ;;  %s427_s27 = int_to_ptr.hbm [resolvable:$true] %s426_s27 }
   0xf   : > { %s428_s28 = scalar_lea.hbm %s427_s27, 16  ;;  %p430_p12 = pneg %p570_p8 }
  0x10   : > { %p429_p11 = scmp.ne.s32.totalorder %s427_s27, %s428_s28  ;;  %s433_s4 = scalar_lea.hbm %s616_s1, 16 }
  0x11   : > { %p435_p1 = scmp.lt.s32.totalorder %s433_s4, %s428_s28 }
  0x12   : > { %p431_p13 = pnand %p430_p12, %p429_p11 }
  0x14   : > { %p432_p0 = pneg %p431_p13 }
  0x16   : > { %p437_p2 = pnand %p435_p1, %p432_p0 }
  0x18   : > { %440 = shalt.err (!%p437_p2)
}
  0x19   : > { %s506_s5 = smov 128   ;;  %s507_s6 = smov 8  }
  0x1a   : > { %373 = dma.hbm_to_vmem [thread:$0]  (!%p570_p8), %s146_s23, 256, %s148_s25, [#allocation7], %s506_s5, %s506_s5, %s507_s6  }
  0x1b   : > { %p156_p3 = pnand %p358_p9, %p155_p10 }
  0x1c   : > { %s161_s7 = sand.u32 (!%p156_p3), 1, %s491_s15  }
  0x1d   : > { %159 = sbr.rel (%p156_p3) target bundleno = 51 (0x33), region = 24  ;;  %s359_s8 = sshll.u32 (!%p156_p3), %s161_s7, 4 }
  0x1e   : > { %s162_s9 = scalar_lea.sflag (!%p156_p3), [#allocation7], %s161_s7  ;;  %s165_s10 = scalar_lea.vmem (!%p156_p3), [#allocation6], %s359_s8 }
  0x22   : > { %481 = dma.done.wait (%p562_p6), %s162_s9, 256  }
  0x23   : > { %483 = vsyncadd (%p562_p6), %s162_s9, 4294967040  ;;  %p194_p4 = scmp.lt.s32.totalorder %s495_s16, 1  ;;  %s362_s11 = sshll.u32 %s495_s16, 4  ;;  %v213_v0 = vlaneseq  ;;  %v209_v7 = vld [vmem:[%s165_s10] sm:$0xff]  ;;  %v210_v8 = vld [vmem:[%s165_s10 + $0x8] sm:$0xff]  ;;  %v508_v10 = vmov 0.0  }
  0x24   : > { %s208_s12 = sld [smem:[#allocation5]]  ;;  %v216_v1 = vstv %s362_s11 }
  0x25   : > { %v214_v2 = vshrl.u32 %v213_v0, 7  ;;  %s627_s16 = smov (!%p194_p4, %s495_s16), 1 }
  0x26   : > { %s360_s13 = sshll.u32 %s627_s16, 3 }
  0x27   : > { %v215_v3 = vadd.s32 8, %v214_v2  ;;  %v217_v4 = vadd.s32 %v216_v1, %v214_v2  ;;  %s197_s20 = scalar_lea.vmem %s617_s2, %s360_s13  ;;  %s201_s23 = scalar_lea.vmem %s618_s3, %s360_s13 }
  0x29   : > { %v218_v5 = vadd.s32 %v216_v1, %v215_v3  ;;  %vm222_vm0 = vcmp.lt.s32.totalorder %v217_v4, 16 }
  0x2a   : > { %v219_v6 = vstv %s208_s12 }
  0x2b   : > { %vm220_vm1 = vcmp.ge.f32.partialorder %v209_v7, %v219_v6  ;;  %vm221_vm2 = vcmp.ge.f32.partialorder %v210_v8, %v219_v6  ;;  %vm223_vm3 = vcmp.lt.s32.totalorder %v218_v5, 16 }
  0x2c   : > { %vm224_vm4 = vmand %vm220_vm1, %vm222_vm0 }
  0x2d   : > { %vm225_vm5 = vmand %vm221_vm2, %vm223_vm3  ;;  %v226_v9 = vsel %vm224_vm4, %v209_v7, 0.0  ;;  %v363_v11 = vsel %vm224_vm4, 1.0, %v508_v10 }
  0x2e   : > { %v227_v12 = vsel %vm225_vm5, %v210_v8, 0.0  ;;  %v364_v13 = vsel %vm225_vm5, 1.0, %v508_v10 }
  0x2f   : > { %v229_v14 = vadd.f32 %v227_v12, %v226_v9  ;;  %v237_v15 = vadd.f32 %v364_v13, %v363_v11 }
  0x31   : > { %244 = vst [vmem:[%s197_s20] sm:$0xff] %v229_v14 }
  0x32   : > { %246 = vst [vmem:[%s201_s23] sm:$0xff] %v237_v15 }
  0x33 PF: > { %s18_s18 = sadd.s32 1, %s503_s18   ;;  %s621_s14 = smov %s491_s15 }
  0x34   : > { %p15_p5 = scmp.ge.s32.totalorder %s18_s18, 4   ;;  %s605_s15 = smov 0  }
  0x35   : > { %s622_s16 = smov %s499_s17  ;;  %s623_s17 = smov %s625_s19 }
  0x36   :  { %17 = sbr.rel (!%p15_p5) target bundleno = 6 (0x6), region = 84 }
  0x3b   :  { %280 = vsyncpa [#allocation7], 1 }
  0x3c   :  { %282 = vsyncpa [#allocation7 + $0x1], 1 }

</bundles_post_ra>
